<compile_context>
chip_gen: v5e
topology: v5e:2x2
jax: 0.10.0
libtpu: 0.0.40
codegen_flags: <defaults>
</compile_context>

<pallas_src>
import functools

import jax
import jax.numpy as jnp
from jax.experimental import pallas as pl
from jax.experimental.pallas import tpu as pltpu


def _round_up(n, m):
    return ((n + m - 1) // m) * m


def _cdiv(a, b):
    return -(-a // b)


def _layernorm(h, gamma, beta, eps=1e-5):
    # PyTorch nn.LayerNorm: biased variance, eps inside the sqrt.
    mu = jnp.mean(h, axis=-1, keepdims=True)
    d = h - mu
    var = jnp.mean(d * d, axis=-1, keepdims=True)
    return d * jax.lax.rsqrt(var + eps) * gamma + beta


def _policy_kernel(
    hidden_dim, half, output_dim, out_pad,
    x_ref, w1_ref, w2_ref, wh1_ref, wh2_ref, vec_ref,
    out_ref,
):
    cdt = w1_ref.dtype                         # MXU operand dtype (f32 or bf16)
    f32 = jnp.float32
    # Exact f32 matmuls in the f32 path; irrelevant for bf16 operands.
    prec = jax.lax.Precision.HIGHEST if cdt == jnp.float32 else None

    # Packed row vectors: [b1, g1, bt1, b2, g2, bt2, bh1, bh2] (one (8, W) slab).
    b1 = vec_ref[0:1, :hidden_dim]
    g1 = vec_ref[1:2, :hidden_dim]
    bt1 = vec_ref[2:3, :hidden_dim]
    b2 = vec_ref[3:4, :hidden_dim]
    g2 = vec_ref[4:5, :hidden_dim]
    bt2 = vec_ref[5:6, :hidden_dim]
    bh1 = vec_ref[6:7, :2 * half]
    bh2 = vec_ref[7:8, :out_pad]

    x = x_ref[...].astype(cdt)                 # cast in-kernel (x DMA'd in caller dtype)

    # ---- shared trunk: Linear -> LayerNorm -> ReLU (x2), f32 accumulation ----
    h = jnp.dot(x, w1_ref[...], preferred_element_type=f32, precision=prec) + b1
    h = jnp.maximum(_layernorm(h, g1, bt1), 0.0)

    h = jnp.dot(h.astype(cdt), w2_ref[...], preferred_element_type=f32, precision=prec) + b2
    h = jnp.maximum(_layernorm(h, g2, bt2), 0.0)

    # ---- fused heads, layer 1: [wa1 | wv1] -> one MXU pass ----
    y = jnp.dot(h.astype(cdt), wh1_ref[...], preferred_element_type=f32, precision=prec) + bh1
    y = jnp.maximum(y, 0.0)

    # ---- fused heads, layer 2: block-diagonal [wa2 ; wv2], lane-padded to 128 ----
    z = jnp.dot(y.astype(cdt), wh2_ref[...], preferred_element_type=f32, precision=prec) + bh2

    # Lane masks from a single-row iota (broadcasts; no (tb, out_pad) int32 tensor).
    col = jax.lax.broadcasted_iota(jnp.int32, (1, out_pad), 1)
    is_logit = col < output_dim                # action logits in lanes [0, output_dim)
    is_value = col == output_dim               # value in lane output_dim

    # Masked softmax over the logit lanes only (padding lanes -> exp(-inf) = 0).
    logits = jnp.where(is_logit, z, -jnp.inf)
    logits = logits - jnp.max(logits, axis=-1, keepdims=True)
    e = jnp.exp(logits)
    probs = e / jnp.sum(e, axis=-1, keepdims=True)   # exact: sum(probs) == 1

    # Single lane-dense store: [probs | value | zeros].
    out_ref[...] = jnp.where(is_logit, probs,
                             jnp.where(is_value, z, 0.0)).astype(out_ref.dtype)


def init_params(key, input_dim, hidden_dim, output_dim, dtype=jnp.float32):
    """Orthogonal Linear weights (gain=1), zero biases, LayerNorm gamma=1/beta=0.

    Weights stored as (in_dim, out_dim)."""
    half = hidden_dim // 2
    ortho = jax.nn.initializers.orthogonal(scale=1.0)
    ks = jax.random.split(key, 6)

    def row(dim):
        return jnp.zeros((1, dim), dtype)

    return dict(
        w1=ortho(ks[0], (input_dim, hidden_dim), dtype), b1=row(hidden_dim),
        g1=jnp.ones((1, hidden_dim), dtype), bt1=row(hidden_dim),
        w2=ortho(ks[1], (hidden_dim, hidden_dim), dtype), b2=row(hidden_dim),
        g2=jnp.ones((1, hidden_dim), dtype), bt2=row(hidden_dim),
        wa1=ortho(ks[2], (hidden_dim, half), dtype), ba1=row(half),
        wa2=ortho(ks[3], (half, output_dim), dtype), ba2=row(output_dim),
        wv1=ortho(ks[4], (hidden_dim, half), dtype), bv1=row(half),
        wv2=ortho(ks[5], (half, 1), dtype), bv2=row(1),
    )


@functools.partial(
    jax.jit,
    static_argnames=("output_dim", "block_rows", "compute_dtype", "out_dtype"),
)
def multi_head_policy_forward(
    x, params, output_dim, block_rows=1024,
    compute_dtype=jnp.float32, out_dtype=jnp.float32,
):
    """Returns (action_probs (B, output_dim), value (B, 1)).

    block_rows: target batch tile. ~1024-2048 rows keeps per-grid-step overhead
      amortized; at these feature dims even 2048-row tiles fit comfortably in
      VMEM on every gen (v7x included), so no blanket halving is applied.
    compute_dtype: MXU operand dtype. bf16 is recommended on v5e/v6e/v7x (MXU is
      bf16-native everywhere); LayerNorm/softmax stay f32 regardless.
    out_dtype: dtype of the lane-dense output slab. bf16 halves the dominant HBM
      write stream (biggest win on v5e); keep f32 when exact outputs are needed.
    """
    batch, input_dim = x.shape
    hidden_dim = params["w1"].shape[1]
    half = params["wa1"].shape[1]
    out_pad = max(128, _round_up(output_dim + 1, 128))   # lane-dense output slab width
    cdt = compute_dtype
    f32 = jnp.float32

    # ---- fuse head weights + pack all (1, dim) vectors into one resident slab ----
    wh1 = jnp.concatenate([params["wa1"], params["wv1"]], axis=1).astype(cdt)
    wh2 = jnp.zeros((2 * half, out_pad), cdt)
    wh2 = wh2.at[:half, :output_dim].set(params["wa2"].astype(cdt))
    wh2 = wh2.at[half:, output_dim:output_dim + 1].set(params["wv2"].astype(cdt))

    vec_w = _round_up(max(out_pad, hidden_dim, 2 * half), 128)
    vecs = jnp.zeros((8, vec_w), f32)
    for r, v in enumerate((params["b1"], params["g1"], params["bt1"],
                           params["b2"], params["g2"], params["bt2"])):
        vecs = vecs.at[r, :hidden_dim].set(v.reshape(-1).astype(f32))
    bh1 = jnp.concatenate([params["ba1"], params["bv1"]], axis=1).astype(f32)
    vecs = vecs.at[6, :2 * half].set(bh1.reshape(-1))
    vecs = vecs.at[7, :output_dim].set(params["ba2"].reshape(-1).astype(f32))
    vecs = vecs.at[7, output_dim].set(params["bv2"].reshape(()).astype(f32))

    param_args = (params["w1"].astype(cdt), params["w2"].astype(cdt), wh1, wh2, vecs)

    # ---- balanced batch tiling; >=2 (even) tiles when possible for v7x megacore ----
    num_tiles = max(1, _cdiv(batch, block_rows))
    if num_tiles == 1 and batch >= 16:
        num_tiles = 2                       # give the second TensorCore work (v7x)
    if num_tiles > 1 and num_tiles % 2:
        num_tiles += 1                      # even tile count shards cleanly across 2 TCs
    tb = _round_up(_cdiv(batch, num_tiles), 8)
    b_pad = num_tiles * tb
    xk = x if b_pad == batch else jnp.pad(x, ((0, b_pad - batch), (0, 0)))
    grid = (num_tiles,)

    def resident(a):
        return pl.BlockSpec(a.shape, lambda i: (0, 0))

    in_specs = [pl.BlockSpec((tb, input_dim), lambda i: (i, 0))] + [
        resident(a) for a in param_args
    ]
    out_specs = pl.BlockSpec((tb, out_pad), lambda i: (i, 0))

    # ---- explicit VMEM budget from per-tile footprint (>= scoped default, <= 64 MiB) ----
    out_isz = jnp.dtype(out_dtype).itemsize
    param_bytes = sum(int(a.size) * a.dtype.itemsize for a in param_args)
    tile_bytes = (
        2 * tb * input_dim * x.dtype.itemsize      # double-buffered x tile
        + 2 * tb * out_pad * out_isz               # double-buffered out tile
        + 2 * param_bytes                          # resident params
        + 8 * tb * max(hidden_dim, 2 * half, out_pad) * 4   # live f32 intermediates
    )
    vmem_limit = int(min(64 << 20, max(32 << 20, tile_bytes + (4 << 20))))

    flops = 2 * b_pad * (
        input_dim * hidden_dim + hidden_dim * hidden_dim
        + hidden_dim * 2 * half + 2 * half * out_pad
    )
    bytes_accessed = (
        b_pad * input_dim * x.dtype.itemsize + b_pad * out_pad * out_isz + param_bytes
    )
    transcendentals = b_pad * (out_pad + 3)        # exp lanes + 2 rsqrt + divide

    slab = pl.pallas_call(
        functools.partial(_policy_kernel, hidden_dim, half, output_dim, out_pad),
        out_shape=jax.ShapeDtypeStruct((b_pad, out_pad), out_dtype),
        grid=grid,
        in_specs=in_specs,
        out_specs=out_specs,
        compiler_params=pltpu.CompilerParams(
            dimension_semantics=("parallel",),
            vmem_limit_bytes=vmem_limit,
        ),
        cost_estimate=pl.CostEstimate(
            flops=flops, transcendentals=transcendentals, bytes_accessed=bytes_accessed
        ),
    )(xk, *param_args)

    probs = slab[:batch, :output_dim]
    value = slab[:batch, output_dim:output_dim + 1]
    return probs, value


def _reference_forward(x, params):
    # Plain-JAX reference for sanity checking the kernel.
    def ln(h, g, b):
        mu = h.mean(-1, keepdims=True)
        var = ((h - mu) ** 2).mean(-1, keepdims=True)
        return (h - mu) / jnp.sqrt(var + 1e-5) * g + b

    h = jnp.maximum(ln(x @ params["w1"] + params["b1"], params["g1"], params["bt1"]), 0)
    h = jnp.maximum(ln(h @ params["w2"] + params["b2"], params["g2"], params["bt2"]), 0)
    a = jnp.maximum(h @ params["wa1"] + params["ba1"], 0)
    logits = a @ params["wa2"] + params["ba2"]
    probs = jax.nn.softmax(logits, axis=-1)
    v = jnp.maximum(h @ params["wv1"] + params["bv1"], 0)
    value = v @ params["wv2"] + params["bv2"]
    return probs, value


if __name__ == "__main__":
    # TODO(synk): hidden_dim=32 / output_dim=4 leave most of each 128-lane vreg as
    # padding; MXU utilization is capped by the model definition, not the kernel.
    input_dim, hidden_dim, output_dim = 16, 32, 4
    batch = 2

    key = jax.random.PRNGKey(0)
    k_x, k_p = jax.random.split(key)
    x = jax.random.normal(k_x, (batch, input_dim), jnp.float32)
    params = init_params(k_p, input_dim, hidden_dim, output_dim)

    ref_probs, ref_value = _reference_forward(x, params)

    # f32 MXU operands (exact path).
    probs, value = multi_head_policy_forward(x, params, output_dim)
    jax.block_until_ready((probs, value))
    assert probs.shape == (batch, output_dim) and value.shape == (batch, 1)
    assert jnp.allclose(jnp.sum(probs, axis=-1), 1.0, atol=1e-3)
    assert jnp.allclose(probs, ref_probs, atol=2e-3, rtol=2e-3)
    assert jnp.allclose(value, ref_value, atol=5e-3, rtol=5e-3)

    # Multi-tile grid path (balanced tiles, >=2 tiles, padded tail rows).
    x2 = jax.random.normal(jax.random.PRNGKey(1), (40, input_dim), jnp.float32)
    ref_probs2, ref_value2 = _reference_forward(x2, params)
    probs2, value2 = multi_head_policy_forward(x2, params, output_dim)
    jax.block_until_ready((probs2, value2))
    assert probs2.shape == (40, output_dim) and value2.shape == (40, 1)
    assert jnp.allclose(jnp.sum(probs2, axis=-1), 1.0, atol=1e-3)
    assert jnp.allclose(probs2, ref_probs2, atol=2e-3, rtol=2e-3)
    assert jnp.allclose(value2, ref_value2, atol=5e-3, rtol=5e-3)

    # bf16 MXU operands (recommended fast path on v5e/v6e/v7x) — looser tolerance.
    probs_bf, value_bf = multi_head_policy_forward(
        x, params, output_dim, compute_dtype=jnp.bfloat16
    )
    jax.block_until_ready((probs_bf, value_bf))
    assert jnp.allclose(probs_bf, ref_probs, atol=5e-2)
    assert jnp.allclose(value_bf, ref_value, atol=1e-1)

    print("KERNEL_OK")
</pallas_src>

<mosaic_0001>
module attributes {stable_mosaic.version = 11 : i64} {
  func.func @_policy_kernel(%arg0: i32, %arg1: memref<8x16xf32, #tpu.memory_space<vmem>>, %arg2: memref<16x32xf32, #tpu.memory_space<vmem>>, %arg3: memref<32x32xf32, #tpu.memory_space<vmem>>, %arg4: memref<32x32xf32, #tpu.memory_space<vmem>>, %arg5: memref<32x128xf32, #tpu.memory_space<vmem>>, %arg6: memref<8x128xf32, #tpu.memory_space<vmem>>, %arg7: memref<8x128xf32, #tpu.memory_space<vmem>>) attributes {dimension_semantics = [#tpu.dimension_semantics<parallel>], iteration_bounds = array<i64: 1>, scalar_prefetch = 0 : i64, scratch_operands = 0 : i64, tpu.core_type = #tpu.core_type<tc>, window_params = [{transform_indices = @transform_0, window_bounds = array<i64: 8, 16>}, {pipeline_mode = #tpu.pipeline_mode<synchronous>, transform_indices = @transform_1, window_bounds = array<i64: 16, 32>}, {pipeline_mode = #tpu.pipeline_mode<synchronous>, transform_indices = @transform_2, window_bounds = array<i64: 32, 32>}, {pipeline_mode = #tpu.pipeline_mode<synchronous>, transform_indices = @transform_3, window_bounds = array<i64: 32, 32>}, {pipeline_mode = #tpu.pipeline_mode<synchronous>, transform_indices = @transform_4, window_bounds = array<i64: 32, 128>}, {pipeline_mode = #tpu.pipeline_mode<synchronous>, transform_indices = @transform_5, window_bounds = array<i64: 8, 128>}, {transform_indices = @transform_6, window_bounds = array<i64: 8, 128>}]} {
    %c0 = arith.constant 0 : index
    %c0_0 = arith.constant 0 : index
    %0 = vector.load %arg6[%c0, %c0_0] : memref<8x128xf32, #tpu.memory_space<vmem>>, vector<1x32xf32>
    %c1 = arith.constant 1 : index
    %c0_1 = arith.constant 0 : index
    %1 = vector.load %arg6[%c1, %c0_1] : memref<8x128xf32, #tpu.memory_space<vmem>>, vector<1x32xf32>
    %c2 = arith.constant 2 : index
    %c0_2 = arith.constant 0 : index
    %2 = vector.load %arg6[%c2, %c0_2] : memref<8x128xf32, #tpu.memory_space<vmem>>, vector<1x32xf32>
    %c3 = arith.constant 3 : index
    %c0_3 = arith.constant 0 : index
    %3 = vector.load %arg6[%c3, %c0_3] : memref<8x128xf32, #tpu.memory_space<vmem>>, vector<1x32xf32>
    %c4 = arith.constant 4 : index
    %c0_4 = arith.constant 0 : index
    %4 = vector.load %arg6[%c4, %c0_4] : memref<8x128xf32, #tpu.memory_space<vmem>>, vector<1x32xf32>
    %c5 = arith.constant 5 : index
    %c0_5 = arith.constant 0 : index
    %5 = vector.load %arg6[%c5, %c0_5] : memref<8x128xf32, #tpu.memory_space<vmem>>, vector<1x32xf32>
    %c6 = arith.constant 6 : index
    %c0_6 = arith.constant 0 : index
    %6 = vector.load %arg6[%c6, %c0_6] : memref<8x128xf32, #tpu.memory_space<vmem>>, vector<1x32xf32>
    %c7 = arith.constant 7 : index
    %c0_7 = arith.constant 0 : index
    %7 = vector.load %arg6[%c7, %c0_7] : memref<8x128xf32, #tpu.memory_space<vmem>>, vector<1x128xf32>
    %c0_8 = arith.constant 0 : index
    %c0_9 = arith.constant 0 : index
    %8 = vector.load %arg1[%c0_8, %c0_9] : memref<8x16xf32, #tpu.memory_space<vmem>>, vector<8x16xf32>
    %c0_10 = arith.constant 0 : index
    %c0_11 = arith.constant 0 : index
    %9 = vector.load %arg2[%c0_10, %c0_11] : memref<16x32xf32, #tpu.memory_space<vmem>>, vector<16x32xf32>
    %cst = arith.constant dense<0.000000e+00> : vector<8x32xf32>
    %10 = tpu.matmul %8, %9, %cst {dimension_numbers = #tpu.dot_dimension_numbers<[1], [0], [0], [1], [0, 0, 1, 1], [], []>, precision = #tpu.contract_precision<fp32>} : vector<8x16xf32>, vector<16x32xf32>, vector<8x32xf32> -> vector<8x32xf32>
    %11 = vector.broadcast %0 : vector<1x32xf32> to vector<8x32xf32>
    %12 = arith.addf %10, %11 : vector<8x32xf32>
    %cst_12 = arith.constant dense<0.000000e+00> : vector<8xf32>
    %13 = vector.multi_reduction <add>, %12, %cst_12 [1] : vector<8x32xf32> to vector<8xf32>
    %14 = vector.shape_cast %13 : vector<8xf32> to vector<8x1xf32>
    %cst_13 = arith.constant 3.200000e+01 : f32
    %15 = vector.broadcast %cst_13 : f32 to vector<8x1xf32>
    %16 = arith.divf %14, %15 : vector<8x1xf32>
    %17 = vector.broadcast %16 : vector<8x1xf32> to vector<8x32xf32>
    %18 = arith.subf %12, %17 : vector<8x32xf32>
    %19 = arith.mulf %18, %18 : vector<8x32xf32>
    %cst_14 = arith.constant dense<0.000000e+00> : vector<8xf32>
    %20 = vector.multi_reduction <add>, %19, %cst_14 [1] : vector<8x32xf32> to vector<8xf32>
    %21 = vector.shape_cast %20 : vector<8xf32> to vector<8x1xf32>
    %cst_15 = arith.constant 3.200000e+01 : f32
    %22 = vector.broadcast %cst_15 : f32 to vector<8x1xf32>
    %23 = arith.divf %21, %22 : vector<8x1xf32>
    %cst_16 = arith.constant 9.99999974E-6 : f32
    %24 = vector.broadcast %cst_16 : f32 to vector<8x1xf32>
    %25 = arith.addf %23, %24 : vector<8x1xf32>
    %26 = math.rsqrt %25 : vector<8x1xf32>
    %27 = vector.broadcast %26 : vector<8x1xf32> to vector<8x32xf32>
    %28 = arith.mulf %18, %27 : vector<8x32xf32>
    %29 = vector.broadcast %1 : vector<1x32xf32> to vector<8x32xf32>
    %30 = arith.mulf %28, %29 : vector<8x32xf32>
    %31 = vector.broadcast %2 : vector<1x32xf32> to vector<8x32xf32>
    %32 = arith.addf %30, %31 : vector<8x32xf32>
    %cst_17 = arith.constant 0.000000e+00 : f32
    %33 = vector.broadcast %cst_17 : f32 to vector<8x32xf32>
    %34 = arith.maximumf %32, %33 : vector<8x32xf32>
    %c0_18 = arith.constant 0 : index
    %c0_19 = arith.constant 0 : index
    %35 = vector.load %arg3[%c0_18, %c0_19] : memref<32x32xf32, #tpu.memory_space<vmem>>, vector<32x32xf32>
    %cst_20 = arith.constant dense<0.000000e+00> : vector<8x32xf32>
    %36 = tpu.matmul %34, %35, %cst_20 {dimension_numbers = #tpu.dot_dimension_numbers<[1], [0], [0], [1], [0, 0, 1, 1], [], []>, precision = #tpu.contract_precision<fp32>} : vector<8x32xf32>, vector<32x32xf32>, vector<8x32xf32> -> vector<8x32xf32>
    %37 = vector.broadcast %3 : vector<1x32xf32> to vector<8x32xf32>
    %38 = arith.addf %36, %37 : vector<8x32xf32>
    %cst_21 = arith.constant dense<0.000000e+00> : vector<8xf32>
    %39 = vector.multi_reduction <add>, %38, %cst_21 [1] : vector<8x32xf32> to vector<8xf32>
    %40 = vector.shape_cast %39 : vector<8xf32> to vector<8x1xf32>
    %cst_22 = arith.constant 3.200000e+01 : f32
    %41 = vector.broadcast %cst_22 : f32 to vector<8x1xf32>
    %42 = arith.divf %40, %41 : vector<8x1xf32>
    %43 = vector.broadcast %42 : vector<8x1xf32> to vector<8x32xf32>
    %44 = arith.subf %38, %43 : vector<8x32xf32>
    %45 = arith.mulf %44, %44 : vector<8x32xf32>
    %cst_23 = arith.constant dense<0.000000e+00> : vector<8xf32>
    %46 = vector.multi_reduction <add>, %45, %cst_23 [1] : vector<8x32xf32> to vector<8xf32>
    %47 = vector.shape_cast %46 : vector<8xf32> to vector<8x1xf32>
    %cst_24 = arith.constant 3.200000e+01 : f32
    %48 = vector.broadcast %cst_24 : f32 to vector<8x1xf32>
    %49 = arith.divf %47, %48 : vector<8x1xf32>
    %cst_25 = arith.constant 9.99999974E-6 : f32
    %50 = vector.broadcast %cst_25 : f32 to vector<8x1xf32>
    %51 = arith.addf %49, %50 : vector<8x1xf32>
    %52 = math.rsqrt %51 : vector<8x1xf32>
    %53 = vector.broadcast %52 : vector<8x1xf32> to vector<8x32xf32>
    %54 = arith.mulf %44, %53 : vector<8x32xf32>
    %55 = vector.broadcast %4 : vector<1x32xf32> to vector<8x32xf32>
    %56 = arith.mulf %54, %55 : vector<8x32xf32>
    %57 = vector.broadcast %5 : vector<1x32xf32> to vector<8x32xf32>
    %58 = arith.addf %56, %57 : vector<8x32xf32>
    %cst_26 = arith.constant 0.000000e+00 : f32
    %59 = vector.broadcast %cst_26 : f32 to vector<8x32xf32>
    %60 = arith.maximumf %58, %59 : vector<8x32xf32>
    %c0_27 = arith.constant 0 : index
    %c0_28 = arith.constant 0 : index
    %61 = vector.load %arg4[%c0_27, %c0_28] : memref<32x32xf32, #tpu.memory_space<vmem>>, vector<32x32xf32>
    %cst_29 = arith.constant dense<0.000000e+00> : vector<8x32xf32>
    %62 = tpu.matmul %60, %61, %cst_29 {dimension_numbers = #tpu.dot_dimension_numbers<[1], [0], [0], [1], [0, 0, 1, 1], [], []>, precision = #tpu.contract_precision<fp32>} : vector<8x32xf32>, vector<32x32xf32>, vector<8x32xf32> -> vector<8x32xf32>
    %63 = vector.broadcast %6 : vector<1x32xf32> to vector<8x32xf32>
    %64 = arith.addf %62, %63 : vector<8x32xf32>
    %cst_30 = arith.constant 0.000000e+00 : f32
    %65 = vector.broadcast %cst_30 : f32 to vector<8x32xf32>
    %66 = arith.maximumf %64, %65 : vector<8x32xf32>
    %c0_31 = arith.constant 0 : index
    %c0_32 = arith.constant 0 : index
    %67 = vector.load %arg5[%c0_31, %c0_32] : memref<32x128xf32, #tpu.memory_space<vmem>>, vector<32x128xf32>
    %cst_33 = arith.constant dense<0.000000e+00> : vector<8x128xf32>
    %68 = tpu.matmul %66, %67, %cst_33 {dimension_numbers = #tpu.dot_dimension_numbers<[1], [0], [0], [1], [0, 0, 1, 1], [], []>, precision = #tpu.contract_precision<fp32>} : vector<8x32xf32>, vector<32x128xf32>, vector<8x128xf32> -> vector<8x128xf32>
    %69 = vector.broadcast %7 : vector<1x128xf32> to vector<8x128xf32>
    %70 = arith.addf %68, %69 : vector<8x128xf32>
    %71 = tpu.iota {dimensions = array<i32: 1>} : vector<1x128xi32>
    %c4_i32 = arith.constant 4 : i32
    %72 = vector.broadcast %c4_i32 : i32 to vector<1x128xi32>
    %73 = arith.cmpi slt, %71, %72 : vector<1x128xi32>
    %c4_i32_34 = arith.constant 4 : i32
    %74 = vector.broadcast %c4_i32_34 : i32 to vector<1x128xi32>
    %75 = arith.cmpi eq, %71, %74 : vector<1x128xi32>
    %cst_35 = arith.constant 0xFF800000 : f32
    %76 = vector.shape_cast %73 : vector<1x128xi1> to vector<1x128xi1>
    %77 = vector.broadcast %76 : vector<1x128xi1> to vector<8x128xi1>
    %78 = vector.broadcast %cst_35 : f32 to vector<8x128xf32>
    %79 = arith.select %77, %70, %78 : vector<8x128xi1>, vector<8x128xf32>
    %cst_36 = arith.constant dense<0xFF800000> : vector<8xf32>
    %80 = vector.multi_reduction <maximumf>, %79, %cst_36 [1] : vector<8x128xf32> to vector<8xf32>
    %81 = vector.shape_cast %80 : vector<8xf32> to vector<8x1xf32>
    %82 = vector.broadcast %81 : vector<8x1xf32> to vector<8x128xf32>
    %83 = arith.subf %79, %82 : vector<8x128xf32>
    %84 = math.exp %83 : vector<8x128xf32>
    %cst_37 = arith.constant dense<0.000000e+00> : vector<8xf32>
    %85 = vector.multi_reduction <add>, %84, %cst_37 [1] : vector<8x128xf32> to vector<8xf32>
    %86 = vector.shape_cast %85 : vector<8xf32> to vector<8x1xf32>
    %87 = vector.broadcast %86 : vector<8x1xf32> to vector<8x128xf32>
    %88 = arith.divf %84, %87 : vector<8x128xf32>
    %cst_38 = arith.constant 0.000000e+00 : f32
    %89 = vector.shape_cast %75 : vector<1x128xi1> to vector<1x128xi1>
    %90 = vector.broadcast %89 : vector<1x128xi1> to vector<8x128xi1>
    %91 = vector.broadcast %cst_38 : f32 to vector<8x128xf32>
    %92 = arith.select %90, %70, %91 : vector<8x128xi1>, vector<8x128xf32>
    %93 = vector.shape_cast %73 : vector<1x128xi1> to vector<1x128xi1>
    %94 = vector.broadcast %93 : vector<1x128xi1> to vector<8x128xi1>
    %95 = arith.select %94, %88, %92 : vector<8x128xi1>, vector<8x128xf32>
    %c0_39 = arith.constant 0 : index
    %c0_40 = arith.constant 0 : index
    %96 = vector.load %arg7[%c0_39, %c0_40] : memref<8x128xf32, #tpu.memory_space<vmem>>, vector<8x128xf32>
    tpu.vector_store %arg7[%c0_39, %c0_40], %95 {strides = array<i32>} : memref<8x128xf32, #tpu.memory_space<vmem>>, vector<8x128xf32>,
    return
  }
  func.func @transform_0(%arg0: i32) -> (i32, i32) {
    %c0_i32 = arith.constant 0 : i32
    %c0_i32_0 = arith.constant 0 : i32
    return %arg0, %c0_i32 : i32, i32
  }
  func.func @transform_1(%arg0: i32) -> (i32, i32) {
    %c0_i32 = arith.constant 0 : i32
    %c0_i32_0 = arith.constant 0 : i32
    %c0_i32_1 = arith.constant 0 : i32
    return %c0_i32, %c0_i32_0 : i32, i32
  }
  func.func @transform_2(%arg0: i32) -> (i32, i32) {
    %c0_i32 = arith.constant 0 : i32
    %c0_i32_0 = arith.constant 0 : i32
    %c0_i32_1 = arith.constant 0 : i32
    return %c0_i32, %c0_i32_0 : i32, i32
  }
  func.func @transform_3(%arg0: i32) -> (i32, i32) {
    %c0_i32 = arith.constant 0 : i32
    %c0_i32_0 = arith.constant 0 : i32
    %c0_i32_1 = arith.constant 0 : i32
    return %c0_i32, %c0_i32_0 : i32, i32
  }
  func.func @transform_4(%arg0: i32) -> (i32, i32) {
    %c0_i32 = arith.constant 0 : i32
    %c0_i32_0 = arith.constant 0 : i32
    %c0_i32_1 = arith.constant 0 : i32
    return %c0_i32, %c0_i32_0 : i32, i32
  }
  func.func @transform_5(%arg0: i32) -> (i32, i32) {
    %c0_i32 = arith.constant 0 : i32
    %c0_i32_0 = arith.constant 0 : i32
    %c0_i32_1 = arith.constant 0 : i32
    return %c0_i32, %c0_i32_0 : i32, i32
  }
  func.func @transform_6(%arg0: i32) -> (i32, i32) {
    %c0_i32 = arith.constant 0 : i32
    %c0_i32_0 = arith.constant 0 : i32
    return %arg0, %c0_i32 : i32, i32
  }
}

</mosaic_0001>

<bundles_post_ra>
// kernel: multi_head_policy_forward.1
= control target key start
LH: loop header
LB: loop body
LE: loop exit
PB: predicated region body
PF: predicated region fallthrough
CT: control target
= control target key end

     0   :  { %vm35_vm0 = vcmask 130048   ;;  %vm198_vm1 = vcmask 261120   ;;  %v897_v33 = vmov 32.0   ;;  %s1030_s1 = inlined_call_operand.vmem [shape: f32[16,32], index: 1, kind: input, shape index: {}]   ;;  %s1031_s0 = inlined_call_operand.vmem [shape: f32[8,16], index: 0, kind: input, shape index: {}]   ;;  %s1032_s5 = inlined_call_operand.vmem [shape: f32[8,128], index: 5, kind: input, shape index: {}]   ;;  %s1033_s2 = inlined_call_operand.vmem [shape: f32[32,32], index: 2, kind: input, shape index: {}]   ;;  %s1034_s3 = inlined_call_operand.vmem [shape: f32[32,32], index: 3, kind: input, shape index: {}]   ;;  %s1035_s4 = inlined_call_operand.vmem [shape: f32[32,128], index: 4, kind: input, shape index: {}]   ;;  %s1036_s6 = inlined_call_operand.vmem [shape: f32[8,128], index: 6, kind: output, shape index: {}]  }
   0x1   :  { %v33_v0 = vld [vmem:[%s1030_s1 + $0x8] sm:$0xff]  ;;  %v32_v1 = vld [vmem:[%s1030_s1] sm:$0xff]  ;;  %887 = vrcp.f32 %v897_v33  ;;  %v236_v45 = vld [vmem:[%s1033_s2 + $0x18] sm:$0xff] }
   0x2   :  { %v31_v2 = vld [vmem:[%s1031_s0] sm:$0xff]  ;;  %v53_v3 = vand.u32 4294901760, %v33_v0  ;;  %v55_v4 = vand.u32 4294901760, %v32_v1  ;;  %v253_v46 = vand.u32 4294901760, %v236_v45  ;;  %v235_v47 = vld [vmem:[%s1033_s2 + $0x10] sm:$0xff]  ;;  %v234_v50 = vld [vmem:[%s1033_s2 + $0x8] sm:$0xff] }
   0x3   :  { %v37_v5 = vsel %vm35_vm0, %v31_v2, 0  ;;  %v879_v19 = vld [vmem:[%s1032_s5] ss:$0 sm:$0xff]  ;;  %v255_v49 = vand.u32 4294901760, %v235_v47  ;;  %v257_v53 = vand.u32 4294901760, %v234_v50 }
   0x4   :  { %v57_v6 = vand.u32 4294901760, %v37_v5  ;;  %v81_v7 = vsub.f32 %v33_v0, %v53_v3  ;;  %54 = vmatpush.msra.mxu0 %v53_v3  ;;  %v87_v8 = vsub.f32 %v32_v1, %v55_v4  ;;  %138 = vmatpush.msra.mxu3 %v53_v3  ;;  %v283_v48 = vsub.f32 %v236_v45, %v253_v46  ;;  %v233_v54 = vld [vmem:[%s1033_s2] sm:$0xff] }
   0x5   :  { %v289_v52 = vsub.f32 %v235_v47, %v255_v49  ;;  %v295_v57 = vsub.f32 %v234_v50, %v257_v53  ;;  %v259_v58 = vand.u32 4294901760, %v233_v54  ;;  %v456_v47 = vld [vmem:[%s1034_s3 + $0x18] sm:$0xff] }
   0x6   :  { %v58_v9 = vsub.f32 %v37_v5, %v57_v6  ;;  %113 = vmatpush.msra.mxu2 %v81_v7  ;;  %56 = vmatpush.msra.mxu0 %v55_v4  ;;  %v82_v10 = vand.u32 4294901760, %v81_v7  ;;  %v88_v11 = vand.u32 4294901760, %v87_v8  ;;  %v284_v51 = vand.u32 4294901760, %v283_v48 }
   0x7   :  { %140 = vmatpush.msra.mxu3 %v55_v4  ;;  %v888_v34 = vpop.eup %887  ;;  %v290_v56 = vand.u32 4294901760, %v289_v52  ;;  %v296_v61 = vand.u32 4294901760, %v295_v57  ;;  %v301_v62 = vsub.f32 %v233_v54, %v259_v58 }
   0x8   :  { %v59_v12 = vand.u32 4294901760, %v58_v9  ;;  %116 = vmatpush.msra.mxu2 %v87_v8  ;;  %v83_v13 = vsub.f32 %v81_v7, %v82_v10  ;;  %165 = vmatpush.msrb.mxu0 %v82_v10  ;;  %v89_v14 = vsub.f32 %v87_v8, %v88_v11  ;;  %v203_v35 = vmul.f32 32.0, %v888_v34 }
   0x9   :  { %119 = vmatmul.f32.vlgmr.msra.gmra.mxu2 %v58_v9  ;;  %vm207_vm2 = vweird.f32 %v888_v34  ;;  %v285_v55 = vsub.f32 %v283_v48, %v284_v51  ;;  %v291_v60 = vsub.f32 %v289_v52, %v290_v56  ;;  %v297_v0 = vsub.f32 %v295_v57, %v296_v61 }
   0xa   :  { %v60_v15 = vsub.f32 %v58_v9, %v59_v12  ;;  %144 = vmatmul.f32.vlgmr.msra.gmra.mxu3 %v59_v12  ;;  %v84_v16 = vand.u32 4294901760, %v83_v13  ;;  %v90_v17 = vand.u32 4294901760, %v89_v14  ;;  %169 = vmatpush.msrb.mxu0 %v88_v11  ;;  %v204_v36 = vsub.f32 1.0, %v203_v35  ;;  %v880_v14 = vld [vmem:[%s1032_s5 + $0x1] ss:$0 sm:$0xff] }
   0xb   :  { %254 = vmatpush.msrb.mxu2 %v253_v46  ;;  %v286_v59 = vand.u32 4294901760, %v285_v55  ;;  %v292_v63 = vand.u32 4294901760, %v291_v60  ;;  %v302_v1 = vand.u32 4294901760, %v301_v62  ;;  %v298_v2 = vand.u32 4294901760, %v297_v0 }
   0xc   :  { %v61_v18 = vand.u32 4294901760, %v60_v15  ;;  %85 = vmatpush.msra.mxu1 %v84_v16  ;;  %v205_v37 = vmul.f32 %v888_v34, %v204_v36 }
   0xd   :  { %256 = vmatpush.msrb.mxu2 %v255_v49  ;;  %287 = vmatpush.msrb.mxu3 %v286_v59 }
   0xe   :  { %62 = vmatmul.f32.vlgmr.msra.gmra.mxu0 %v61_v18  ;;  %91 = vmatpush.msra.mxu1 %v90_v17  ;;  %v206_v38 = vadd.f32 %v888_v34, %v205_v37  ;;  %v881_v17 = vld [vmem:[%s1032_s5 + $0x2] ss:$0 sm:$0xff] }
   0xf   :  { %93 = vmatmul.f32.vlgmr.msra.gmra.mxu1 %v57_v6  ;;  %325 = vmatpush.msra.mxu0 %v283_v48  ;;  %v473_v48 = vand.u32 4294901760, %v456_v47 }
  0x10   :  { %190 = vmatpush.msrb.mxu1 %v53_v3  ;;  %v946_v39 = vsel %vm207_vm2, %v888_v34, %v206_v38  ;;  %258 = vmatpush.msrb.mxu2 %v257_v53  ;;  %v303_v3 = vsub.f32 %v301_v62, %v302_v1 }
  0x11   :  { %328 = vmatpush.msra.mxu0 %v289_v52  ;;  %293 = vmatpush.msrb.mxu3 %v292_v63  ;;  %v503_v50 = vsub.f32 %v456_v47, %v473_v48  ;;  %v454_v52 = vld [vmem:[%s1034_s3 + $0x8] sm:$0xff] }
  0x12   :  { %192 = vmatpush.msrb.mxu1 %v55_v4  ;;  %260 = vmatpush.msrb.mxu2 %v259_v58  ;;  %v304_v4 = vand.u32 4294901760, %v303_v3  ;;  %v477_v55 = vand.u32 4294901760, %v454_v52 }
  0x13   :  { %331 = vmatpush.msra.mxu0 %v295_v57  ;;  %299 = vmatpush.msrb.mxu3 %v298_v2 }
  0x14   :  { %354 = vmatpush.msra.mxu1 %v253_v46  ;;  %383 = vmatpush.msra.mxu2 %v284_v51  ;;  %v515_v59 = vsub.f32 %v454_v52, %v477_v55 }
  0x15   :  { %334 = vmatpush.msra.mxu0 %v301_v62  ;;  %305 = vmatpush.msrb.mxu3 %v304_v4 }
  0x16   :  { %171 = vmatmul.f32.vlgmr.msrb.gmra.mxu0 %v57_v6  ;;  %356 = vmatpush.msra.mxu1 %v255_v49  ;;  %v516_v63 = vand.u32 4294901760, %v515_v59 }
  0x17   :  { %194 = vmatmul.f32.vlgmr.msrb.gmra.mxu1 %v57_v6  ;;  %387 = vmatpush.msra.mxu2 %v290_v56  ;;  %v453_v56 = vld [vmem:[%s1034_s3] sm:$0xff] }
  0x18   :  { %358 = vmatpush.msra.mxu1 %v257_v53  ;;  %414 = vmatpush.msra.mxu3 %v253_v46  ;;  %v479_v60 = vand.u32 4294901760, %v453_v56  ;;  %v517_v2 = vsub.f32 %v515_v59, %v516_v63 }
  0x19   :  { %391 = vmatpush.msra.mxu2 %v296_v61  ;;  %474 = vmatpush.msrb.mxu0 %v473_v48 }
  0x1a   :  { %360 = vmatpush.msra.mxu1 %v259_v58  ;;  %416 = vmatpush.msra.mxu3 %v255_v49  ;;  %v455_v49 = vld [vmem:[%s1034_s3 + $0x10] sm:$0xff]  ;;  %v521_v0 = vsub.f32 %v453_v56, %v479_v60  ;;  %v518_v4 = vand.u32 4294901760, %v517_v2 }
  0x1b   :  { %395 = vmatpush.msra.mxu2 %v302_v1  ;;  %v475_v51 = vand.u32 4294901760, %v455_v49 }
  0x1c   :  { %418 = vmatpush.msra.mxu3 %v257_v53  ;;  %v504_v53 = vand.u32 4294901760, %v503_v50  ;;  %v522_v3 = vand.u32 4294901760, %v521_v0 }
  0x1d   :  { %v509_v54 = vsub.f32 %v455_v49, %v475_v51  ;;  %476 = vmatpush.msrb.mxu0 %v475_v51 }
  0x1e   :  { %420 = vmatpush.msra.mxu3 %v259_v58  ;;  %v505_v57 = vsub.f32 %v503_v50, %v504_v53 }
  0x1f   :  { %v510_v58 = vand.u32 4294901760, %v509_v54  ;;  %478 = vmatpush.msrb.mxu0 %v477_v55 }
  0x20   :  { %v506_v61 = vand.u32 4294901760, %v505_v57 }
  0x21   :  { %v511_v62 = vsub.f32 %v509_v54, %v510_v58  ;;  %480 = vmatpush.msrb.mxu0 %v479_v60 }
  0x22   :  { %507 = vmatpush.msrb.mxu1 %v506_v61 }
  0x23   :  { %v512_v1 = vand.u32 4294901760, %v511_v62 }
  0x25   :  { %513 = vmatpush.msrb.mxu1 %v512_v1 }
  0x27   :  { %519 = vmatpush.msrb.mxu1 %v518_v4 }
  0x8b   :  { %v63_v20 = vpop.f32.mrf.mxu0 }
  0x8c   :  { %v64_v21 = vadd.f32 %v879_v19, %v63_v20  ;;  %v94_v22 = vpop.f32.mrf.mxu1  ;;  %v120_v23 = vpop.f32.mrf.mxu2 }
  0x8d   :  { %v145_v25 = vpop.f32.mrf.mxu3 }
  0x8e   :  { %v95_v24 = vadd.f32 %v94_v22, %v64_v21 }
  0x90   :  { %v121_v26 = vadd.f32 %v120_v23, %v95_v24 }
  0x92   :  { %v146_v27 = vadd.f32 %v145_v25, %v121_v26 }
  0x93   :  { %v172_v28 = vpop.f32.mrf.mxu0 }
  0x94   :  { %v173_v29 = vadd.f32 %v172_v28, %v146_v27  ;;  %v195_v30 = vpop.f32.mrf.mxu1  ;;  %v882_v27 = vld [vmem:[%s1032_s5 + $0x3] ss:$0 sm:$0xff] }
  0x96   :  { %v196_v31 = vadd.f32 %v195_v30, %v173_v29 }
  0x98   :  { %v199_v32 = vsel %vm198_vm1, %v196_v31, 0.0 }
  0x99   :  { %200 = vadd.xlane.f32.xlu0 %v199_v32 }
 0x10c   :  { %v201_v40 = vpop.xlane.xlu0 %200 }
 0x10d   :  { %v209_v41 = vmul.f32 %v946_v39, %v201_v40 }
 0x10f   :  { %v949_v42 = vsub.f32 %v196_v31, %v209_v41 }
 0x111   :  { %v211_v43 = vmul.f32 %v949_v42, %v949_v42 }
 0x113   :  { %v212_v44 = vsel %vm198_vm1, %v211_v43, 0.0 }
 0x114   :  { %213 = vadd.xlane.f32.xlu0 %v212_v44 }
 0x187   :  { %v214_v5 = vpop.xlane.xlu0 %213 }
 0x188   :  { %v215_v6 = vmul.f32 %v214_v5, %v946_v39  ;;  %v523_v5 = vsub.f32 %v521_v0, %v522_v3 }
 0x18a   :  { %v216_v7 = vadd.f32 1e-05, %v215_v6  ;;  %v524_v6 = vand.u32 4294901760, %v523_v5 }
 0x18c   :  { %889 = vrsqrt.f32 %v216_v7  ;;  %vm223_vm4 = vweird.f32 %v216_v7  ;;  %525 = vmatpush.msrb.mxu1 %v524_v6 }
 0x192   :  { %v890_v8 = vpop.eup %889 }
 0x193   :  { %v218_v9 = vmul.f32 %v890_v8, %v216_v7  ;;  %vm224_vm3 = vweird.f32 %v890_v8 }
 0x194   :  { %vm225_vm5 = vmor %vm223_vm4, %vm224_vm3 }
 0x195   :  { %v219_v10 = vmul.f32 %v890_v8, %v218_v9 }
 0x197   :  { %v220_v11 = vmul.f32 0.5, %v219_v10 }
 0x199   :  { %v221_v12 = vsub.f32 1.5, %v220_v11 }
 0x19b   :  { %v222_v13 = vmul.f32 %v890_v8, %v221_v12 }
 0x19d   :  { %v226_v15 = vsel %vm225_vm5, %v890_v8, %v222_v13 }
 0x19e   :  { %v227_v16 = vmul.f32 %v226_v15, %v949_v42 }
 0x1a0   :  { %v229_v18 = vmul.f32 %v880_v14, %v227_v16 }
 0x1a2   :  { %v231_v19 = vadd.f32 %v881_v17, %v229_v18  ;;  %v884_v18 = vld [vmem:[%s1032_s5 + $0x5] ss:$0 sm:$0xff] }
 0x1a4   :  { %v232_v20 = vmax.f32 %v231_v19, 0.0 }
 0x1a6   :  { %v239_v21 = vsel %vm198_vm1, %v232_v20, 0 }
 0x1a7   :  { %v261_v22 = vand.u32 4294901760, %v239_v21 }
 0x1a9   :  { %307 = vmatmul.f32.vlgmr.msrb.gmra.mxu3 %v261_v22  ;;  %v262_v23 = vsub.f32 %v239_v21, %v261_v22 }
 0x1aa   :  { %574 = vmatpush.msrb.mxu3 %v473_v48 }
 0x1ab   :  { %337 = vmatmul.f32.vlgmr.msra.gmra.mxu0 %v262_v23  ;;  %v263_v24 = vand.u32 4294901760, %v262_v23 }
 0x1ac   :  { %576 = vmatpush.msrb.mxu3 %v475_v51  ;;  %603 = vmatpush.msra.mxu0 %v504_v53  ;;  %v885_v53 = vld [vmem:[%s1032_s5 + $0x6] ss:$0 sm:$0xff] }
 0x1ad   :  { %364 = vmatmul.f32.vlgmr.msra.gmra.mxu1 %v263_v24  ;;  %v264_v25 = vsub.f32 %v262_v23, %v263_v24 }
 0x1ae   :  { %578 = vmatpush.msrb.mxu3 %v477_v55  ;;  %607 = vmatpush.msra.mxu0 %v510_v58 }
 0x1af   :  { %v265_v26 = vand.u32 4294901760, %v264_v25  ;;  %634 = vmatpush.msra.mxu1 %v473_v48 }
 0x1b0   :  { %580 = vmatpush.msrb.mxu3 %v479_v60  ;;  %611 = vmatpush.msra.mxu0 %v516_v63 }
 0x1b1   :  { %266 = vmatmul.f32.vlgmr.msrb.gmra.mxu2 %v265_v26  ;;  %422 = vmatmul.f32.vlgmr.msra.gmra.mxu3 %v261_v22 }
 0x1b2   :  { %545 = vmatpush.msrb.mxu2 %v503_v50  ;;  %615 = vmatpush.msra.mxu0 %v522_v3 }
 0x1b3   :  { %636 = vmatpush.msra.mxu1 %v475_v51 }
 0x1b4   :  { %548 = vmatpush.msrb.mxu2 %v509_v54 }
 0x1b5   :  { %638 = vmatpush.msra.mxu1 %v477_v55 }
 0x1b6   :  { %551 = vmatpush.msrb.mxu2 %v515_v59 }
 0x1b7   :  { %640 = vmatpush.msra.mxu1 %v479_v60 }
 0x1b8   :  { %554 = vmatpush.msrb.mxu2 %v521_v0 }
 0x1b9   :  { %397 = vmatmul.f32.vlgmr.msra.gmra.mxu2 %v261_v22 }
 0x228   :  { %v338_v32 = vpop.f32.mrf.mxu0 }
 0x22a   :  { %v365_v34 = vpop.f32.mrf.mxu1 }
 0x22c   :  { %v308_v28 = vpop.f32.mrf.mxu3 }
 0x234   :  { %v267_v29 = vpop.f32.mrf.mxu2  ;;  %v423_v38 = vpop.f32.mrf.mxu3 }
 0x235   :  { %v268_v30 = vadd.f32 %v882_v27, %v267_v29 }
 0x237   :  { %v309_v31 = vadd.f32 %v308_v28, %v268_v30  ;;  %v650_v28 = vld [vmem:[%s1035_s4 + $0x18] sm:$0xff]  ;;  %v649_v30 = vld [vmem:[%s1035_s4 + $0x10] sm:$0xff] }
 0x238   :  { %v667_v29 = vand.u32 4294901760, %v650_v28 }
 0x239   :  { %v339_v33 = vadd.f32 %v338_v32, %v309_v31  ;;  %v669_v32 = vand.u32 4294901760, %v649_v30 }
 0x23a   :  { %v697_v31 = vsub.f32 %v650_v28, %v667_v29  ;;  %668 = vmatpush.msra.mxu2 %v667_v29 }
 0x23b   :  { %v366_v35 = vadd.f32 %v365_v34, %v339_v33  ;;  %v648_v33 = vld [vmem:[%s1035_s4 + $0x8] sm:$0xff] }
 0x23c   :  { %v398_v36 = vpop.f32.mrf.mxu2  ;;  %v698_v34 = vand.u32 4294901760, %v697_v31  ;;  %670 = vmatpush.msra.mxu2 %v669_v32 }
 0x23d   :  { %v399_v37 = vadd.f32 %v398_v36, %v366_v35  ;;  %v703_v35 = vsub.f32 %v649_v30, %v669_v32  ;;  %v671_v36 = vand.u32 4294901760, %v648_v33 }
 0x23f   :  { %v424_v40 = vadd.f32 %v423_v38, %v399_v37  ;;  %v647_v37 = vld [vmem:[%s1035_s4] sm:$0xff]  ;;  %v699_v38 = vsub.f32 %v697_v31, %v698_v34  ;;  %672 = vmatpush.msra.mxu2 %v671_v36 }
 0x241   :  { %v426_v41 = vsel %vm198_vm1, %v424_v40, 0.0 }
 0x242   :  { %427 = vadd.xlane.f32.xlu1 %v426_v41  ;;  %v709_v41 = vsub.f32 %v648_v33, %v671_v36 }
 0x2b5   :  { %v428_v42 = vpop.xlane.xlu1 %427 }
 0x2b6   :  { %v429_v43 = vmul.f32 %v428_v42, %v946_v39  ;;  %v673_v42 = vand.u32 4294901760, %v647_v37 }
 0x2b8   :  { %v980_v44 = vsub.f32 %v424_v40, %v429_v43  ;;  %v704_v40 = vand.u32 4294901760, %v703_v35  ;;  %v700_v43 = vand.u32 4294901760, %v699_v38  ;;  %674 = vmatpush.msra.mxu2 %v673_v42 }
 0x2ba   :  { %v431_v45 = vmul.f32 %v980_v44, %v980_v44  ;;  %701 = vmatpush.msra.mxu3 %v700_v43 }
 0x2bc   :  { %v432_v46 = vsel %vm198_vm1, %v431_v45, 0.0  ;;  %v710_v45 = vand.u32 4294901760, %v709_v41 }
 0x2bd   :  { %433 = vadd.xlane.f32.xlu1 %v432_v46  ;;  %v715_v46 = vsub.f32 %v647_v37, %v673_v42 }
 0x2be   :  { %v711_v48 = vsub.f32 %v709_v41, %v710_v45 }
 0x2bf   :  { %v716_v49 = vand.u32 4294901760, %v715_v46 }
 0x2c0   :  { %v712_v50 = vand.u32 4294901760, %v711_v48 }
 0x2c1   :  { %v717_v51 = vsub.f32 %v715_v46, %v716_v49 }
 0x2c3   :  { %v718_v52 = vand.u32 4294901760, %v717_v51 }
 0x330   :  { %v434_v7 = vpop.xlane.xlu1 %433 }
 0x331   :  { %v435_v8 = vmul.f32 %v434_v7, %v946_v39  ;;  %v883_v39 = vld [vmem:[%s1032_s5 + $0x4] ss:$0 sm:$0xff] }
 0x333   :  { %v436_v9 = vadd.f32 1e-05, %v435_v8 }
 0x335   :  { %891 = vrsqrt.f32 %v436_v9  ;;  %vm443_vm7 = vweird.f32 %v436_v9 }
 0x33b   :  { %v892_v10 = vpop.eup %891 }
 0x33c   :  { %v438_v11 = vmul.f32 %v892_v10, %v436_v9  ;;  %vm444_vm6 = vweird.f32 %v892_v10  ;;  %v886_v9 = vld [vmem:[%s1032_s5 + $0x7] ss:$0 sm:$0xff] }
 0x33d   :  { %vm445_vm8 = vmor %vm443_vm7, %vm444_vm6 }
 0x33e   :  { %v439_v12 = vmul.f32 %v892_v10, %v438_v11 }
 0x340   :  { %v440_v13 = vmul.f32 0.5, %v439_v12 }
 0x342   :  { %v441_v14 = vsub.f32 1.5, %v440_v13  ;;  %v840_v13 = vlaneseq }
 0x344   :  { %v442_v15 = vmul.f32 %v892_v10, %v441_v14 }
 0x346   :  { %v446_v16 = vsel %vm445_vm8, %v892_v10, %v442_v15 }
 0x347   :  { %v447_v17 = vmul.f32 %v446_v16, %v980_v44  ;;  %v705_v44 = vsub.f32 %v703_v35, %v704_v40 }
 0x349   :  { %v449_v19 = vmul.f32 %v883_v39, %v447_v17  ;;  %v706_v47 = vand.u32 4294901760, %v705_v44  ;;  %v841_v17 = vand.u32 127, %v840_v13 }
 0x34b   :  { %v451_v20 = vadd.f32 %v884_v18, %v449_v19  ;;  %707 = vmatpush.msra.mxu3 %v706_v47  ;;  %vm842_vm9 = vcmp.lt.s32.totalorder %v841_v17, 4  ;;  %vm843_vm10 = vcmp.eq.s32.totalorder %v841_v17, 4 }
 0x34d   :  { %v452_v21 = vmax.f32 %v451_v20, 0.0  ;;  %713 = vmatpush.msra.mxu3 %v712_v50 }
 0x34f   :  { %v459_v22 = vsel %vm198_vm1, %v452_v21, 0  ;;  %719 = vmatpush.msra.mxu3 %v718_v52 }
 0x350   :  { %v481_v23 = vand.u32 4294901760, %v459_v22 }
 0x352   :  { %527 = vmatmul.f32.vlgmr.msrb.gmra.mxu1 %v481_v23  ;;  %v482_v24 = vsub.f32 %v459_v22, %v481_v23 }
 0x353   :  { %768 = vmatpush.msrb.mxu1 %v667_v29 }
 0x354   :  { %557 = vmatmul.f32.vlgmr.msrb.gmra.mxu2 %v482_v24  ;;  %v483_v25 = vand.u32 4294901760, %v482_v24 }
 0x355   :  { %770 = vmatpush.msrb.mxu1 %v669_v32  ;;  %797 = vmatpush.msrb.mxu2 %v698_v34 }
 0x356   :  { %584 = vmatmul.f32.vlgmr.msrb.gmra.mxu3 %v483_v25  ;;  %v484_v26 = vsub.f32 %v482_v24, %v483_v25 }
 0x357   :  { %772 = vmatpush.msrb.mxu1 %v671_v36  ;;  %801 = vmatpush.msrb.mxu2 %v704_v40 }
 0x358   :  { %v485_v27 = vand.u32 4294901760, %v484_v26  ;;  %828 = vmatpush.msrb.mxu3 %v667_v29 }
 0x359   :  { %774 = vmatpush.msrb.mxu1 %v673_v42  ;;  %805 = vmatpush.msrb.mxu2 %v710_v45 }
 0x35a   :  { %486 = vmatmul.f32.vlgmr.msrb.gmra.mxu0 %v485_v27  ;;  %642 = vmatmul.f32.vlgmr.msra.gmra.mxu1 %v481_v23 }
 0x35b   :  { %739 = vmatpush.msrb.mxu0 %v697_v31  ;;  %809 = vmatpush.msrb.mxu2 %v716_v49 }
 0x35c   :  { %830 = vmatpush.msrb.mxu3 %v669_v32 }
 0x35d   :  { %742 = vmatpush.msrb.mxu0 %v703_v35 }
 0x35e   :  { %832 = vmatpush.msrb.mxu3 %v671_v36 }
 0x35f   :  { %745 = vmatpush.msrb.mxu0 %v709_v41 }
 0x360   :  { %834 = vmatpush.msrb.mxu3 %v673_v42 }
 0x361   :  { %748 = vmatpush.msrb.mxu0 %v715_v46 }
 0x362   :  { %617 = vmatmul.f32.vlgmr.msra.gmra.mxu0 %v481_v23 }
 0x3cf   :  { %v528_v54 = vpop.f32.mrf.mxu1 }
 0x3d7   :  { %v487_v55 = vpop.f32.mrf.mxu0  ;;  %v558_v58 = vpop.f32.mrf.mxu2 }
 0x3d8   :  { %v488_v56 = vadd.f32 %v885_v53, %v487_v55  ;;  %v643_v0 = vpop.f32.mrf.mxu1 }
 0x3d9   :  { %v585_v60 = vpop.f32.mrf.mxu3 }
 0x3da   :  { %v529_v57 = vadd.f32 %v528_v54, %v488_v56 }
 0x3dc   :  { %v559_v59 = vadd.f32 %v558_v58, %v529_v57 }
 0x3de   :  { %v586_v61 = vadd.f32 %v585_v60, %v559_v59 }
 0x3df   :  { %v618_v62 = vpop.f32.mrf.mxu0 }
 0x3e0   :  { %v619_v63 = vadd.f32 %v618_v62, %v586_v61 }
 0x3e2   :  { %v644_v1 = vadd.f32 %v643_v0, %v619_v63 }
 0x3e4   :  { %v646_v2 = vmax.f32 %v644_v1, 0.0 }
 0x3e6   :  { %v653_v3 = vsel %vm198_vm1, %v646_v2, 0 }
 0x3e7   :  { %v675_v4 = vand.u32 4294901760, %v653_v3 }
 0x3e9   :  { %v676_v5 = vsub.f32 %v653_v3, %v675_v4  ;;  %721 = vmatmul.f32.vlgmr.msra.gmra.mxu3 %v675_v4 }
 0x3eb   :  { %751 = vmatmul.f32.vlgmr.msrb.gmra.mxu0 %v676_v5  ;;  %v677_v6 = vand.u32 4294901760, %v676_v5 }
 0x3ed   :  { %778 = vmatmul.f32.vlgmr.msrb.gmra.mxu1 %v677_v6  ;;  %v678_v7 = vsub.f32 %v676_v5, %v677_v6 }
 0x3ef   :  { %v679_v8 = vand.u32 4294901760, %v678_v7 }
 0x3f1   :  { %680 = vmatmul.f32.vlgmr.msra.gmra.mxu2 %v679_v8  ;;  %836 = vmatmul.f32.vlgmr.msrb.gmra.mxu3 %v675_v4 }
 0x3f9   :  { %811 = vmatmul.f32.vlgmr.msrb.gmra.mxu2 %v675_v4 }
 0x468   :  { %v752_v15 = vpop.f32.mrf.mxu0 }
 0x46a   :  { %v779_v16 = vpop.f32.mrf.mxu1 }
 0x46c   :  { %v722_v10 = vpop.f32.mrf.mxu3 }
 0x474   :  { %v681_v11 = vpop.f32.mrf.mxu2  ;;  %v837_v21 = vpop.f32.mrf.mxu3 }
 0x475   :  { %v682_v12 = vadd.f32 %v886_v9, %v681_v11 }
 0x477   :  { %v723_v14 = vadd.f32 %v722_v10, %v682_v12 }
 0x479   :  { %v753_v39 = vadd.f32 %v752_v15, %v723_v14 }
 0x47b   :  { %v780_v18 = vadd.f32 %v779_v16, %v753_v39 }
 0x47c   :  { %v812_v19 = vpop.f32.mrf.mxu2 }
 0x47d   :  { %v813_v20 = vadd.f32 %v812_v19, %v780_v18 }
 0x47f   :  { %v838_v22 = vadd.f32 %v837_v21, %v813_v20 }
 0x481   :  { %v846_v23 = vsel %vm842_vm9, %v838_v22, -inf  ;;  %v871_v24 = vsel %vm843_vm10, %v838_v22, 0.0 }
 0x482   :  { %847 = vmax.xlane.f32.xlu2 %v846_v23 }
 0x4f5   :  { %v848_v25 = vpop.xlane.xlu2 %847 }
 0x4f6   :  { %v849_v26 = vsub.f32 %v846_v23, %v848_v25 }
 0x4f8   :  { %v850_v27 = vmul.f32 1.442695, %v849_v26 }
 0x4fa   :  { %893 = vpow2.f32 %v850_v27 }
 0x500   :  { %v894_v28 = vpop.eup %893 }
 0x501   :  { %852 = vadd.xlane.f32.xlu2 %v894_v28 }
 0x574   :  { %v853_v29 = vpop.xlane.xlu2 %852 }
 0x575   :  { %895 = vrcp.f32 %v853_v29  ;;  %v865_v33 = vand.u32 2147483648, %v853_v29  ;;  %v863_v35 = vand.u32 2147483647, %v853_v29  ;;  %vm859_vm12 = vweird.f32 %v853_v29 }
 0x577   :  { %v866_v37 = vor.u32 1.1754944e-38, %v865_v33  ;;  %vm864_vm14 = vcmp.eq.f32.partialorder %v863_v35, 8.507059e+37 }
 0x57b   :  { %v896_v30 = vpop.eup %895 }
 0x57c   :  { %v855_v31 = vmul.f32 %v896_v30, %v853_v29  ;;  %vm860_vm11 = vweird.f32 %v896_v30 }
 0x57d   :  { %vm861_vm13 = vmor %vm859_vm12, %vm860_vm11 }
 0x57e   :  { %v856_v32 = vsub.f32 1.0, %v855_v31 }
 0x580   :  { %v857_v34 = vmul.f32 %v896_v30, %v856_v32 }
 0x582   :  { %v858_v36 = vadd.f32 %v896_v30, %v857_v34 }
 0x584   :  { %v862_v38 = vsel %vm861_vm13, %v896_v30, %v858_v36 }
 0x585   :  { %v867_v40 = vsel %vm864_vm14, %v866_v37, %v862_v38 }
 0x586   :  { %v868_v41 = vmul.f32 %v894_v28, %v867_v40 }
 0x588   :  { %v872_v42 = vsel %vm842_vm9, %v868_v41, %v871_v24 }
 0x589   :  { %873 = vst [vmem:[%s1036_s6] sm:$0xff] %v872_v42 }

</bundles_post_ra>
